<compile_context>
chip_gen: v7x
topology: tpu7x:2x2x1
jax: 0.10.0
libtpu: 0.0.40
codegen_flags: <defaults>
</compile_context>

<pallas_src>
import functools

import jax
import jax.numpy as jnp
from jax import lax
from jax.experimental import pallas as pl
from jax.experimental.pallas import tpu as pltpu


def _center_radius_kernel(w_ref, b_ref, c_ref, r_ref, mu_ref, rout_ref, *,
                          nk, tk, d_in):
    """Process one (tn, tk) tile of W: mu += W @ c, r += |W| @ rad (bias folded at k==0)."""
    k = pl.program_id(1)

    @pl.when(k == 0)
    def _init():
        # Fold the bias into the mu accumulator init; zero the radius accumulator.
        mu_ref[...] = b_ref[...]
        rout_ref[...] = jnp.zeros_like(rout_ref)

    w = w_ref[...]                                   # (tn, tk) streamed W tile (MXU LHS)

    # Static ragged-K handling: only traced when D_in is not tile-aligned (forced K
    # tiling).  Pallas does not zero-fill out-of-bounds block reads, so the invalid
    # trailing columns of the last K tile are masked here.
    rem = d_in - (nk - 1) * tk                       # valid columns in the last K tile
    if rem != tk:
        valid = jnp.where(k == nk - 1, rem, tk)
        col = lax.broadcasted_iota(jnp.int32, w.shape, 1)
        w = jnp.where(col < valid, w, 0.0)

    # W is the moving M-dimension operand; center/radius are tiny (tk, B) stationary RHS.
    mu_ref[...] += jnp.dot(w, c_ref[...], preferred_element_type=jnp.float32)
    rout_ref[...] += jnp.dot(jnp.abs(w), r_ref[...], preferred_element_type=jnp.float32)


def _round_up(x, m):
    return -(-x // m) * m


_MAX_TILE_BYTES = 8 << 20        # ~8 MiB f32 W tile: 2 pipeline buffers + |W| temp fits
_MAX_TN = 1024                   # every generation's VMEM budget (incl. v7x's 64 MiB).


def _choose_tiles(d_out, d_in):
    """Prefer tk == D_in (one contiguous HBM band per step, 1-D effective grid over N);
    grow tn up to the byte budget but keep >= 2 N tiles for the v7x megacore."""
    bpe = 4
    if 8 * d_in * bpe <= _MAX_TILE_BYTES:
        tk = d_in                                                    # full reduction band
    else:
        tk = max(128, (_MAX_TILE_BYTES // (256 * bpe)) // 128 * 128)  # fallback K tiling
    half_out = _round_up(-(-d_out // 2), 8)          # ceil(d_out/2), sublane-aligned
    tn = _MAX_TILE_BYTES // (bpe * tk)
    tn = min(tn, _MAX_TN, max(half_out, 8))
    tn = max(8, (tn // 8) * 8)
    return tn, tk


def _vmem_limit(tn, tk):
    tile = tn * tk * 4
    # 2 pipeline buffers for the W stream + the |W| temp + vectors/accumulators + slack.
    return int(min(max(4 * tile + (8 << 20), 32 << 20), 50 << 20))


def center_radius_linear(W, b, center, radius, *, tn=None, tk=None,
                         vmem_limit_bytes=None):
    """mu = W @ center + b ; r = |W| @ radius   (W given exactly as the module stores it).

    W: (D_out, D_in); b: (D_out,); center/radius: (D_in,) or (D_in, B).
    Returns (mu, r) shaped (D_out,) or (D_out, B), matching the input rank.
    """
    W = jnp.asarray(W, jnp.float32)
    d_out, d_in = W.shape
    center = jnp.asarray(center, jnp.float32)
    radius = jnp.asarray(radius, jnp.float32)
    squeeze = center.ndim == 1
    c = center.reshape(d_in, -1)
    r = radius.reshape(d_in, -1)
    bsz = c.shape[1]

    atn, atk = _choose_tiles(d_out, d_in)
    tn = tn if tn is not None else atn
    tk = tk if tk is not None else atk

    num_n = pl.cdiv(d_out, tn)
    num_k = pl.cdiv(d_in, tk)
    n_pad = num_n * tn
    k_pad = num_k * tk

    # Only the tiny vector operands are ever padded; the (D_out, D_in) weight is streamed
    # unpadded (ragged K edge masked in-kernel, ragged N edge sliced off below).
    if k_pad != d_in:
        c = jnp.pad(c, ((0, k_pad - d_in), (0, 0)))
        r = jnp.pad(r, ((0, k_pad - d_in), (0, 0)))
    b_mat = jnp.broadcast_to(jnp.asarray(b, jnp.float32).reshape(d_out, 1), (d_out, bsz))

    kernel = functools.partial(_center_radius_kernel, nk=num_k, tk=tk, d_in=d_in)

    mu, rout = pl.pallas_call(
        kernel,
        out_shape=(
            jax.ShapeDtypeStruct((n_pad, bsz), jnp.float32),
            jax.ShapeDtypeStruct((n_pad, bsz), jnp.float32),
        ),
        grid=(num_n, num_k),                                   # reduction axis last
        in_specs=[
            pl.BlockSpec((tn, tk), lambda n, k: (n, k)),       # W tile (streamed, untransposed)
            pl.BlockSpec((tn, bsz), lambda n, k: (n, 0)),      # bias (used only at k == 0)
            pl.BlockSpec((tk, bsz), lambda n, k: (k, 0)),      # center column(s)
            pl.BlockSpec((tk, bsz), lambda n, k: (k, 0)),      # radius column(s)
        ],
        out_specs=(
            pl.BlockSpec((tn, bsz), lambda n, k: (n, 0)),      # mu accumulator (VMEM-resident over k)
            pl.BlockSpec((tn, bsz), lambda n, k: (n, 0)),      # r accumulator
        ),
        compiler_params=pltpu.CompilerParams(
            dimension_semantics=("parallel", "arbitrary"),
            vmem_limit_bytes=vmem_limit_bytes or _vmem_limit(tn, tk),
        ),
    )(W, b_mat, c, r)

    mu = mu[:d_out]
    rout = rout[:d_out]
    if squeeze:
        return mu[:, 0], rout[:, 0]
    return mu, rout


if __name__ == "__main__":
    key = jax.random.PRNGKey(0)

    def check(d_out, d_in, bsz=None, tn=None, tk=None):
        kw, kb, kc, kr = jax.random.split(jax.random.fold_in(key, d_out * 1009 + d_in), 4)
        # W stands for the module's stored parameter `layer.weight.t()`.
        W = jax.random.normal(kw, (d_out, d_in), dtype=jnp.float32) * 0.1
        b = jax.random.normal(kb, (d_out,), dtype=jnp.float32) * 0.1
        cshape = (d_in,) if bsz is None else (d_in, bsz)
        center = jax.random.normal(kc, cshape, dtype=jnp.float32)
        radius = jnp.abs(jax.random.normal(kr, cshape, dtype=jnp.float32))

        mu, rad = center_radius_linear(W, b, center, radius, tn=tn, tk=tk)
        jax.block_until_ready((mu, rad))

        # Pure-JAX reference of the PyTorch forward.
        bias_ref = b if bsz is None else b[:, None]
        mu_ref = W @ center + bias_ref
        r_ref = jnp.abs(W) @ radius
        assert jnp.allclose(mu, mu_ref, atol=1e-4, rtol=1e-4), f"mu mismatch {d_out}x{d_in} B={bsz}"
        assert jnp.allclose(rad, r_ref, atol=1e-4, rtol=1e-4), f"r mismatch {d_out}x{d_in} B={bsz}"

    check(48, 32)                        # tiny rectangular layer, auto tiles (2 N tiles)
    check(200, 200)                      # ragged D: tk = full D_in, no host W pad, 1 K step
    check(200, 200, tn=128, tk=128)      # forced K tiling -> exercises in-kernel edge masking
    check(136, 200, bsz=3)               # batched interval propagation, one W stream for all B
    print("KERNEL_OK")
</pallas_src>

<mosaic_0001>
module attributes {stable_mosaic.version = 11 : i64} {
  func.func @_center_radius_kernel(%arg0: i32, %arg1: i32, %arg2: memref<24x32xf32, #tpu.memory_space<vmem>>, %arg3: memref<24x1xf32, #tpu.memory_space<vmem>>, %arg4: memref<32x1xf32, #tpu.memory_space<vmem>>, %arg5: memref<32x1xf32, #tpu.memory_space<vmem>>, %arg6: memref<24x1xf32, #tpu.memory_space<vmem>>, %arg7: memref<24x1xf32, #tpu.memory_space<vmem>>) attributes {dimension_semantics = [#tpu.dimension_semantics<parallel>, #tpu.dimension_semantics<arbitrary>], iteration_bounds = array<i64: 2, 1>, scalar_prefetch = 0 : i64, scratch_operands = 0 : i64, tpu.core_type = #tpu.core_type<tc>, window_params = [{transform_indices = @transform_0, window_bounds = array<i64: 24, 32>}, {transform_indices = @transform_1, window_bounds = array<i64: 24, 1>}, {transform_indices = @transform_2, window_bounds = array<i64: 32, 1>}, {transform_indices = @transform_3, window_bounds = array<i64: 32, 1>}, {transform_indices = @transform_4, window_bounds = array<i64: 24, 1>}, {transform_indices = @transform_5, window_bounds = array<i64: 24, 1>}]} {
    %c0_i32 = arith.constant 0 : i32
    %0 = arith.cmpi eq, %arg1, %c0_i32 : i32
    %1 = arith.extui %0 : i1 to i32
    %c0_i32_0 = arith.constant 0 : i32
    %2 = arith.cmpi ne, %1, %c0_i32_0 : i32
    scf.if %2 {
      %c0_15 = arith.constant 0 : index
      %c0_16 = arith.constant 0 : index
      %15 = vector.load %arg3[%c0_15, %c0_16] : memref<24x1xf32, #tpu.memory_space<vmem>>, vector<24x1xf32>
      %c0_17 = arith.constant 0 : index
      %c0_18 = arith.constant 0 : index
      %16 = vector.load %arg6[%c0_17, %c0_18] : memref<24x1xf32, #tpu.memory_space<vmem>>, vector<24x1xf32>
      tpu.vector_store %arg6[%c0_17, %c0_18], %15 {strides = array<i32>} : memref<24x1xf32, #tpu.memory_space<vmem>>, vector<24x1xf32>,
      %cst_19 = arith.constant 0.000000e+00 : f32
      %17 = vector.broadcast %cst_19 : f32 to vector<24x1xf32>
      %c0_20 = arith.constant 0 : index
      %c0_21 = arith.constant 0 : index
      %18 = vector.load %arg7[%c0_20, %c0_21] : memref<24x1xf32, #tpu.memory_space<vmem>>, vector<24x1xf32>
      tpu.vector_store %arg7[%c0_20, %c0_21], %17 {strides = array<i32>} : memref<24x1xf32, #tpu.memory_space<vmem>>, vector<24x1xf32>,
    } else {
    }
    %c0 = arith.constant 0 : index
    %c0_1 = arith.constant 0 : index
    %3 = vector.load %arg2[%c0, %c0_1] : memref<24x32xf32, #tpu.memory_space<vmem>>, vector<24x32xf32>
    %c0_2 = arith.constant 0 : index
    %c0_3 = arith.constant 0 : index
    %4 = vector.load %arg6[%c0_2, %c0_3] : memref<24x1xf32, #tpu.memory_space<vmem>>, vector<24x1xf32>
    %c0_4 = arith.constant 0 : index
    %c0_5 = arith.constant 0 : index
    %5 = vector.load %arg4[%c0_4, %c0_5] : memref<32x1xf32, #tpu.memory_space<vmem>>, vector<32x1xf32>
    %cst = arith.constant dense<0.000000e+00> : vector<24x1xf32>
    %6 = tpu.matmul %3, %5, %cst {dimension_numbers = #tpu.dot_dimension_numbers<[1], [0], [0], [1], [0, 0, 1, 1], [], []>} : vector<24x32xf32>, vector<32x1xf32>, vector<24x1xf32> -> vector<24x1xf32>
    %7 = arith.addf %4, %6 : vector<24x1xf32>
    %c0_6 = arith.constant 0 : index
    %c0_7 = arith.constant 0 : index
    %8 = vector.load %arg6[%c0_6, %c0_7] : memref<24x1xf32, #tpu.memory_space<vmem>>, vector<24x1xf32>
    tpu.vector_store %arg6[%c0_6, %c0_7], %7 {strides = array<i32>} : memref<24x1xf32, #tpu.memory_space<vmem>>, vector<24x1xf32>,
    %c0_8 = arith.constant 0 : index
    %c0_9 = arith.constant 0 : index
    %9 = vector.load %arg7[%c0_8, %c0_9] : memref<24x1xf32, #tpu.memory_space<vmem>>, vector<24x1xf32>
    %10 = math.absf %3 : vector<24x32xf32>
    %c0_10 = arith.constant 0 : index
    %c0_11 = arith.constant 0 : index
    %11 = vector.load %arg5[%c0_10, %c0_11] : memref<32x1xf32, #tpu.memory_space<vmem>>, vector<32x1xf32>
    %cst_12 = arith.constant dense<0.000000e+00> : vector<24x1xf32>
    %12 = tpu.matmul %10, %11, %cst_12 {dimension_numbers = #tpu.dot_dimension_numbers<[1], [0], [0], [1], [0, 0, 1, 1], [], []>} : vector<24x32xf32>, vector<32x1xf32>, vector<24x1xf32> -> vector<24x1xf32>
    %13 = arith.addf %9, %12 : vector<24x1xf32>
    %c0_13 = arith.constant 0 : index
    %c0_14 = arith.constant 0 : index
    %14 = vector.load %arg7[%c0_13, %c0_14] : memref<24x1xf32, #tpu.memory_space<vmem>>, vector<24x1xf32>
    tpu.vector_store %arg7[%c0_13, %c0_14], %13 {strides = array<i32>} : memref<24x1xf32, #tpu.memory_space<vmem>>, vector<24x1xf32>,
    return
  }
  func.func @transform_0(%arg0: i32, %arg1: i32) -> (i32, i32) {
    %c0_i32 = arith.constant 0 : i32
    return %arg0, %arg1 : i32, i32
  }
  func.func @transform_1(%arg0: i32, %arg1: i32) -> (i32, i32) {
    %c0_i32 = arith.constant 0 : i32
    %c0_i32_0 = arith.constant 0 : i32
    return %arg0, %c0_i32 : i32, i32
  }
  func.func @transform_2(%arg0: i32, %arg1: i32) -> (i32, i32) {
    %c0_i32 = arith.constant 0 : i32
    %c0_i32_0 = arith.constant 0 : i32
    return %arg1, %c0_i32 : i32, i32
  }
  func.func @transform_3(%arg0: i32, %arg1: i32) -> (i32, i32) {
    %c0_i32 = arith.constant 0 : i32
    %c0_i32_0 = arith.constant 0 : i32
    return %arg1, %c0_i32 : i32, i32
  }
  func.func @transform_4(%arg0: i32, %arg1: i32) -> (i32, i32) {
    %c0_i32 = arith.constant 0 : i32
    %c0_i32_0 = arith.constant 0 : i32
    return %arg0, %c0_i32 : i32, i32
  }
  func.func @transform_5(%arg0: i32, %arg1: i32) -> (i32, i32) {
    %c0_i32 = arith.constant 0 : i32
    %c0_i32_0 = arith.constant 0 : i32
    return %arg0, %c0_i32 : i32, i32
  }
}

</mosaic_0001>

<bundles_post_ra>
// kernel: tpu_custom_call.1
= control target key start
LH: loop header
LB: loop body
LE: loop exit
PB: predicated region body
PF: predicated region fallthrough
CT: control target
= control target key end

     0   :  { %s864_s18 = smov 0   ;;  %s866_s19 = smov 0   ;;  %s976_s0 = inlined_call_operand.vmem [shape: f32[48,32], index: 0, kind: input, shape index: {}]   ;;  %s977_s1 = inlined_call_operand.vmem [shape: f32[48,1], index: 1, kind: input, shape index: {}]   ;;  %s978_s2 = inlined_call_operand.vmem [shape: f32[32,1], index: 2, kind: input, shape index: {}]   ;;  %s979_s3 = inlined_call_operand.vmem [shape: f32[32,1], index: 3, kind: input, shape index: {}]   ;;  %s980_s4 = inlined_call_operand.vmem [shape: f32[48,1], index: 4, kind: output, shape index: {0}]   ;;  %s981_s5 = inlined_call_operand.vmem [shape: f32[48,1], index: 5, kind: output, shape index: {1}]  }
   0x1   :  { %s868_s20 = smov 0  }
   0x2 LB: > { %s28_s21 = sadd.s32 1, %s825_s19  ;;  %p707_p0 = scmp.ge.s32.totalorder %s829_s20, 1  ;;  %s829_s20 = sphi %s868_s20, %s16_s20   ;;  %s825_s19 = sphi %s866_s19, %s983_s19   ;;  %s821_s18 = sphi %s864_s18, %s982_s18  }
   0x3   : > { %p30_p1 = scmp.ge.s32.totalorder %s28_s21, 2  ;;  %p241_p2 = scmp.lt.s32.totalorder %s829_s20, 3 }
   0x5   : > { %s985_s21 = smov (%p30_p1, %s28_s21), 0  ;;  %p242_p3 = pnand %p707_p0, %p241_p2 }
   0x6   : > { %v351_v0 = vld [vmem:[%s978_s2] sm:$0xff] (!%p242_p3)  ;;  %v352_v1 = vld [vmem:[%s978_s2 + $0x8] sm:$0xff] (!%p242_p3)  ;;  %v831_v3 = vmov (!%p242_p3), 0.0|0.0   ;;  %v353_v6 = vld [vmem:[%s978_s2 + $0x10] sm:$0xff] (!%p242_p3)  ;;  %s292_s9 = smul.u32 (!%p242_p3), 3, %s821_s18  ;;  %vm832_vm0 = vmmov (!%p242_p3), 0  }
   0x7   : > { %245 = sbr.rel (%p242_p3) target bundleno = 244 (0xf4), region = 36  ;;  %v458_v2 = vld [vmem:[%s979_s3] sm:$0xff] (!%p242_p3)  ;;  %768 = vmatprep.subr.bf16.mxu0 (!%p242_p3), %v831_v3  ;;  %v769_v4 = vpack.c.bf16 (!%p242_p3), %v352_v1, %v351_v0  ;;  %774 = vmatprep.subr.bf16.mxu1 (!%p242_p3), %v831_v3  ;;  %v459_v5 = vld [vmem:[%s979_s3 + $0x8] sm:$0xff] (!%p242_p3)  ;;  %v354_v7 = vld [vmem:[%s978_s2 + $0x18] sm:$0xff] (!%p242_p3)  ;;  %v833_v11 = vmov (!%p242_p3), 0.0   ;;  %vm338_vm1 = vcmask (!%p242_p3), 7168  }
   0x8   : > { %v775_v8 = vpack.c.bf16 (!%p242_p3), %v459_v5, %v458_v2  ;;  %v460_v9 = vld [vmem:[%s979_s3 + $0x10] sm:$0xff] (!%p242_p3)  ;;  %v461_v10 = vld [vmem:[%s979_s3 + $0x18] sm:$0xff] (!%p242_p3)  ;;  %742 = vmatprep.mubr.msk.f32.mxu0 (!%p242_p3), %vm832_vm0, %v833_v11  ;;  %759 = vmatprep.mubr.msk.f32.mxu1 (!%p242_p3), %vm832_vm0, %v833_v11  ;;  %v772_v12 = vpack.c.bf16 (!%p242_p3), %v354_v7, %v353_v6  ;;  %p293_p4 = scmp.lt.s32.totalorder (!%p242_p3), %s292_s9, 5  ;;  %vm355_vm2 = vcmask (!%p242_p3), 261120  }
   0x9   : > { %770 = vmatpush3.bf16.msra.mxu0 (!%p242_p3), %v769_v4  ;;  %v778_v13 = vpack.c.bf16 (!%p242_p3), %v461_v10, %v460_v9 }
   0xa   : > { %776 = vmatpush3.bf16.msra.mxu1 (!%p242_p3), %v775_v8  ;;  %771 = vmatprep.subr.bf16.mxu0 (!%p242_p3), %v831_v3 }
   0xb   : > { %777 = vmatprep.subr.bf16.mxu1 (!%p242_p3), %v831_v3 }
   0xd   : > { %773 = vmatpush3.bf16.msra.mxu0 (!%p242_p3), %v772_v12 }
   0xe   : > { %s987_s9 = smov (!%p293_p4, %s292_s9), 5  ;;  %779 = vmatpush3.bf16.msra.mxu1 %v778_v13 }
   0xf   : > { %s708_s14 = sshll.u32 %s987_s9, 3 }
  0x10   : > { %s299_s17 = scalar_lea.vmem %s976_s0, %s708_s14  ;;  %s305_s23 = scalar_lea.vmem %s977_s1, %s708_s14 }
  0x11   : > { %s920_s26 = scalar_lea.vmem %s980_s4, %s708_s14  ;;  %s925_s29 = scalar_lea.vmem %s981_s5, %s708_s14  ;;  %v335_v14 = vld [vmem:[%s305_s23] sm:$0xff]  ;;  %v336_v15 = vld [vmem:[%s305_s23 + $0x8] sm:$0xff]  ;;  %v337_v16 = vld [vmem:[%s305_s23 + $0x10] sm:$0xff] }
  0x12   : > { %339 = vst.msk [vmem:[%s920_s26] sm:$0xff] %vm338_vm1, %v335_v14  ;;  %v345_v17 = vld [vmem:[%s299_s17] sm:$0xff]  ;;  %342 = vst.msk [vmem:[%s925_s29] sm:$0xff] %vm338_vm1, %v833_v11  ;;  %v346_v18 = vld [vmem:[%s299_s17 + $0x8] sm:$0xff] }
  0x13   : > { %340 = vst.msk [vmem:[%s920_s26 + $0x8] sm:$0xff] %vm338_vm1, %v336_v15  ;;  %743 = vmatmul.mubr.msk.f32.vlgmr.msra.gmra.mrb[0].mxu0 %vm355_vm2, %v345_v17  ;;  %v455_v19 = vand.u32 2147483647, %v345_v17  ;;  %343 = vst.msk [vmem:[%s925_s29 + $0x8] sm:$0xff] %vm338_vm1, %v833_v11  ;;  %v456_v20 = vand.u32 2147483647, %v346_v18 }
  0x14   : > { %341 = vst.msk [vmem:[%s920_s26 + $0x10] sm:$0xff] %vm338_vm1, %v337_v16  ;;  %344 = vst.msk [vmem:[%s925_s29 + $0x10] sm:$0xff] %vm338_vm1, %v833_v11  ;;  %745 = vmatprep.mubr.msk.f32.mxu0 %vm832_vm0, %v833_v11  ;;  %v347_v21 = vld [vmem:[%s299_s17 + $0x10] sm:$0xff] }
  0x15   : > { %760 = vmatmul.mubr.msk.f32.vlgmr.msra.gmra.mrb[0].mxu1 %vm355_vm2, %v455_v19  ;;  %v457_v22 = vand.u32 2147483647, %v347_v21 }
  0x16   : > { %762 = vmatprep.mubr.msk.f32.mxu1 %vm832_vm0, %v833_v11 }
  0x17   : > { %746 = vmatmul.mubr.msk.f32.gmra.mrb[2].mxu0 %vm355_vm2, %v346_v18 }
  0x18   : > { %748 = vmatprep.mubr.msk.f32.mxu0 %vm832_vm0, %v833_v11 }
  0x19   : > { %763 = vmatmul.mubr.msk.f32.gmra.mrb[2].mxu1 %vm355_vm2, %v456_v20  ;;  %v348_v23 = vld [vmem:[%s920_s26] sm:$0xff] }
  0x1a   : > { %765 = vmatprep.mubr.msk.f32.mxu1 %vm832_vm0, %v833_v11  ;;  %v452_v25 = vld [vmem:[%s925_s29] sm:$0xff]  ;;  %v349_v26 = vld [vmem:[%s920_s26 + $0x8] sm:$0xff] }
  0x1b   : > { %749 = vmatmul.mubr.msk.f32.gmra.mrb[4].mxu0 %vm355_vm2, %v347_v21  ;;  %v350_v27 = vld [vmem:[%s920_s26 + $0x10] sm:$0xff]  ;;  %v453_v31 = vld [vmem:[%s925_s29 + $0x8] sm:$0xff] }
  0x1c   : > { %v454_v32 = vld [vmem:[%s925_s29 + $0x10] sm:$0xff] }
  0x1d   : > { %766 = vmatmul.mubr.msk.f32.gmra.mrb[4].mxu1 %vm355_vm2, %v457_v22 }
  0xe6   : > { %v431_v24 = vpop.f32.mrb[0].mxu0 }
  0xe7   : > { %v445_v28 = vadd.f32 %v431_v24, %v348_v23  ;;  %v744_v29 = vpop.f32.mrb[1].mxu0 }
  0xe8   : > { %v537_v30 = vpop.f32.mrb[0].mxu1 }
  0xe9   : > { %v551_v33 = vadd.f32 %v537_v30, %v452_v25  ;;  %v761_v34 = vpop.f32.mrb[1].mxu1  ;;  %449 = vst.msk [vmem:[%s920_s26] sm:$0xff] %vm338_vm1, %v445_v28 }
  0xea   : > { %v436_v35 = vpop.f32.mrb[2].mxu0 }
  0xeb   : > { %v446_v36 = vadd.f32 %v436_v35, %v349_v26  ;;  %v747_v37 = vpop.f32.mrb[3].mxu0  ;;  %554 = vst.msk [vmem:[%s925_s29] sm:$0xff] %vm338_vm1, %v551_v33 }
  0xec   : > { %v542_v38 = vpop.f32.mrb[2].mxu1 }
  0xed   : > { %v552_v39 = vadd.f32 %v542_v38, %v453_v31  ;;  %v764_v40 = vpop.f32.mrb[3].mxu1  ;;  %450 = vst.msk [vmem:[%s920_s26 + $0x8] sm:$0xff] %vm338_vm1, %v446_v36 }
  0xee   : > { %v441_v41 = vpop.f32.mrb[4].mxu0 }
  0xef   : > { %v447_v42 = vadd.f32 %v441_v41, %v350_v27  ;;  %v750_v43 = vpop.f32.mrb[5].mxu0  ;;  %555 = vst.msk [vmem:[%s925_s29 + $0x8] sm:$0xff] %vm338_vm1, %v552_v39 }
  0xf0   : > { %v547_v44 = vpop.f32.mrb[4].mxu1 }
  0xf1   : > { %451 = vst.msk [vmem:[%s920_s26 + $0x10] sm:$0xff] %vm338_vm1, %v447_v42  ;;  %v553_v45 = vadd.f32 %v547_v44, %v454_v32  ;;  %v767_v46 = vpop.f32.mrb[5].mxu1 }
  0xf3   : > { %556 = vst.msk [vmem:[%s925_s29 + $0x10] sm:$0xff] %vm338_vm1, %v553_v45 }
  0xf4 PF: > { %s16_s20 = sadd.s32 1, %s829_s20   ;;  %s982_s18 = smov %s825_s19 }
  0xf5   : > { %p13_p5 = scmp.ge.s32.totalorder %s16_s20, 4   ;;  %s983_s19 = smov %s985_s21 }
  0xf7   :  { %15 = sbr.rel (!%p13_p5) target bundleno = 2 (0x2), region = 91 }

</bundles_post_ra>
